<compile_context>
chip_gen: v6e
topology: v6e:2x2x1
jax: 0.10.0
libtpu: 0.0.40
codegen_flags: <defaults>
</compile_context>

<pallas_src>
import jax
import jax.numpy as jnp
from jax import lax
from jax.experimental import pallas as pl
from jax.experimental.pallas import tpu as pltpu


# ------------------------------ kernel ------------------------------------- #
def _make_kernel(NB, H, WCin, WCout, has_projection):
    M = NB * H  # rows per grid step (batched matmul M dimension)

    def _conv3x3(x, b_ref, is_first, is_last):
        # x: (M, WC) f32.  Build the dy=-1 / dy=+1 operands with sublane rolls
        # (XLU) + boundary-row masks (VPU select); no padded scratch, no
        # misaligned slices, no cross-image row leakage.
        up = jnp.where(is_first, 0.0, pltpu.roll(x, shift=1, axis=0))      # row h-1
        dn = jnp.where(is_last, 0.0, pltpu.roll(x, shift=M - 1, axis=0))   # row h+1
        lhs = jnp.concatenate([up, x, dn], axis=1).astype(jnp.bfloat16)
        return jnp.dot(lhs, b_ref[...], preferred_element_type=jnp.float32)

    def _body(x, b1_ref, b2_ref, bn_ref, sc, is_first, is_last):
        y = _conv3x3(x, b1_ref, is_first, is_last)                 # conv1
        y = jnp.maximum(y * bn_ref[0:1, :] + bn_ref[1:2, :], 0.0)  # bn1 + relu
        y = _conv3x3(y, b2_ref, is_first, is_last)                 # conv2
        y = y * bn_ref[2:3, :] + bn_ref[3:4, :]                    # bn2
        return jnp.maximum(y + sc, 0.0)                            # residual + relu

    def _row_masks():
        row = lax.broadcasted_iota(jnp.int32, (M, 1), 0) % H
        return row == 0, row == H - 1

    if has_projection:
        def kernel(x_ref, b1_ref, b2_ref, bsc_ref, bn_ref, out_ref):
            x = x_ref[...]                                          # (M, WCin) f32
            is_first, is_last = _row_masks()
            sc = jnp.dot(x.astype(jnp.bfloat16), bsc_ref[...],
                         preferred_element_type=jnp.float32)        # 1x1 conv
            sc = sc * bn_ref[4:5, :] + bn_ref[5:6, :]               # shortcut bn
            out_ref[...] = _body(x, b1_ref, b2_ref, bn_ref, sc,
                                 is_first, is_last).astype(out_ref.dtype)
    else:
        def kernel(x_ref, b1_ref, b2_ref, bn_ref, out_ref):
            x = x_ref[...]                                          # (M, WCin) f32
            is_first, is_last = _row_masks()
            out_ref[...] = _body(x, b1_ref, b2_ref, bn_ref, x,
                                 is_first, is_last).astype(out_ref.dtype)
    return kernel


# --------------------------- parameter prep -------------------------------- #
def _banded_3x3(w, W, dtype):
    # OIHW (Co, Ci, 3, 3) -> (3*W*Ci, W*Co) banded row-conv matrix (padding=1
    # in W baked into the band structure).
    wp = jnp.transpose(w, (2, 3, 1, 0)).astype(jnp.float32)          # (dy, dx, ci, co)
    wq = jnp.arange(W)
    masks = jnp.stack(
        [(wq[:, None] == wq[None, :] + dx - 1).astype(jnp.float32)
         for dx in range(3)])                                        # (dx, w_in, w_out)
    B = jnp.einsum('xpw,yxio->ypiwo', masks, wp)                     # (dy, w', ci, w, co)
    return B.reshape(3 * W * w.shape[1], W * w.shape[0]).astype(dtype)


def _banded_1x1(w, W, dtype):
    # (Co, Ci, 1, 1) -> block-diagonal (W*Ci, W*Co) matrix.
    wt = jnp.transpose(w[:, :, 0, 0], (1, 0)).astype(jnp.float32)    # (ci, co)
    B = jnp.einsum('pw,io->piwo', jnp.eye(W, dtype=jnp.float32), wt)
    return B.reshape(W * w.shape[1], W * w.shape[0]).astype(dtype)


def _bn_fold(g, b, m, v, W, eps=1e-5):
    s = (g / jnp.sqrt(v + eps)).astype(jnp.float32)
    t = (b - m * s).astype(jnp.float32)
    return jnp.tile(s, W), jnp.tile(t, W)                            # (W*C,)


def prepare_basic_block(params, W, weight_dtype=jnp.bfloat16):
    """Hoisted, once-per-parameter-set preparation (banded weights + BN fold)."""
    Cout, Cin = params['w1'].shape[0], params['w1'].shape[1]
    has_projection = 'wsc' in params
    s1, t1 = _bn_fold(params['bn1_g'], params['bn1_b'], params['bn1_m'], params['bn1_v'], W)
    s2, t2 = _bn_fold(params['bn2_g'], params['bn2_b'], params['bn2_m'], params['bn2_v'], W)
    if has_projection:
        ssc, tsc = _bn_fold(params['bnsc_g'], params['bnsc_b'],
                            params['bnsc_m'], params['bnsc_v'], W)
    else:
        ssc = tsc = jnp.zeros((W * Cout,), jnp.float32)
    z = jnp.zeros((W * Cout,), jnp.float32)
    prep = {
        'B1': _banded_3x3(params['w1'], W, weight_dtype),            # (3*W*Cin, W*Cout)
        'B2': _banded_3x3(params['w2'], W, weight_dtype),            # (3*W*Cout, W*Cout)
        'bn': jnp.stack([s1, t1, s2, t2, ssc, tsc, z, z]),           # (8, W*Cout) packed
        'Cin': Cin, 'Cout': Cout, 'W': W, 'has_projection': has_projection,
    }
    if has_projection:
        prep['Bsc'] = _banded_1x1(params['wsc'], W, weight_dtype)    # (W*Cin, W*Cout)
    return prep


# ------------------------------ forward ------------------------------------ #
def basic_block_rows(x_rows, prep, block_images=None, out_dtype=jnp.float32):
    """Forward on lane-dense rows. x_rows: (N, H, W*Cin) -> (N, H, W*Cout)."""
    N, H, WCin = x_rows.shape
    W, Cout = prep['W'], prep['Cout']
    WCout = W * Cout
    has_projection = prep['has_projection']
    assert WCin == W * prep['Cin']

    # Images per grid step; NB*H is the matmul M.  NB=8 -> M=128 (fills v5e
    # MXU); use block_images=16 -> M=256 for v6e/v7x when N allows.
    NB = block_images if block_images is not None else max(1, min(8, N))
    Npad = -(-N // NB) * NB
    if Npad != N:
        x_rows = jnp.concatenate(
            [x_rows, jnp.zeros((Npad - N, H, WCin), x_rows.dtype)], axis=0)

    x2d = x_rows.reshape(Npad * H, WCin).astype(jnp.float32)
    MB = NB * H

    args = [x2d, prep['B1'], prep['B2']]
    in_specs = [
        pl.BlockSpec((MB, WCin), lambda n: (n, 0)),                  # batched rows
        pl.BlockSpec(prep['B1'].shape, lambda n: (0, 0)),            # conv1 banded taps
        pl.BlockSpec(prep['B2'].shape, lambda n: (0, 0)),            # conv2 banded taps
    ]
    if has_projection:
        args.append(prep['Bsc'])
        in_specs.append(pl.BlockSpec(prep['Bsc'].shape, lambda n: (0, 0)))
    args.append(prep['bn'])
    in_specs.append(pl.BlockSpec((8, WCout), lambda n: (0, 0)))      # packed BN vectors

    kernel = _make_kernel(NB, H, WCin, WCout, has_projection)

    out = pl.pallas_call(
        kernel,
        out_shape=jax.ShapeDtypeStruct((Npad * H, WCout), out_dtype),
        grid_spec=pltpu.PrefetchScalarGridSpec(
            num_scalar_prefetch=0,
            grid=(Npad // NB,),
            in_specs=in_specs,
            out_specs=pl.BlockSpec((MB, WCout), lambda n: (n, 0)),   # lane-dense stores
        ),
        compiler_params=pltpu.CompilerParams(dimension_semantics=("parallel",)),
    )(*args)

    return out.reshape(Npad, H, WCout)[:N]


def basic_block_pallas(x_nchw, prep, **kw):
    """NCHW boundary wrapper around the lane-dense forward."""
    N, Cin, H, W = x_nchw.shape
    x_rows = jnp.transpose(x_nchw, (0, 2, 3, 1)).reshape(N, H, W * Cin)
    out_rows = basic_block_rows(x_rows, prep, **kw)
    Cout = prep['Cout']
    return jnp.transpose(out_rows.reshape(N, H, W, Cout), (0, 3, 1, 2))


# --------------------------- pure-JAX reference ---------------------------- #
def _bn_ref(x, g, b, m, v, eps=1e-5):
    s = g / jnp.sqrt(v + eps)
    return x * s[None, :, None, None] + (b - m * s)[None, :, None, None]


def basic_block_ref(x, params):
    dn = lax.conv_dimension_numbers(x.shape, params['w1'].shape, ('NCHW', 'OIHW', 'NCHW'))
    out = lax.conv_general_dilated(x, params['w1'], (1, 1), ((1, 1), (1, 1)),
                                   dimension_numbers=dn)
    out = jnp.maximum(_bn_ref(out, params['bn1_g'], params['bn1_b'],
                              params['bn1_m'], params['bn1_v']), 0.0)
    dn2 = lax.conv_dimension_numbers(out.shape, params['w2'].shape, ('NCHW', 'OIHW', 'NCHW'))
    out = lax.conv_general_dilated(out, params['w2'], (1, 1), ((1, 1), (1, 1)),
                                   dimension_numbers=dn2)
    out = _bn_ref(out, params['bn2_g'], params['bn2_b'], params['bn2_m'], params['bn2_v'])
    if 'wsc' in params:
        dn1 = lax.conv_dimension_numbers(x.shape, params['wsc'].shape,
                                         ('NCHW', 'OIHW', 'NCHW'))
        sc = lax.conv_general_dilated(x, params['wsc'], (1, 1), ((0, 0), (0, 0)),
                                      dimension_numbers=dn1)
        sc = _bn_ref(sc, params['bnsc_g'], params['bnsc_b'],
                     params['bnsc_m'], params['bnsc_v'])
    else:
        sc = x
    return jnp.maximum(out + sc, 0.0)


# --------------------------------- main ------------------------------------ #
if __name__ == "__main__":
    key = jax.random.PRNGKey(0)

    def make_params(key, cin, planes, with_projection):
        ks = jax.random.split(key, 16)
        p = {
            'w1': jax.random.normal(ks[0], (planes, cin, 3, 3), jnp.float32) * 0.1,
            'bn1_g': 1.0 + 0.1 * jax.random.normal(ks[1], (planes,), jnp.float32),
            'bn1_b': 0.1 * jax.random.normal(ks[2], (planes,), jnp.float32),
            'bn1_m': 0.05 * jax.random.normal(ks[3], (planes,), jnp.float32),
            'bn1_v': 1.0 + 0.1 * jax.nn.softplus(jax.random.normal(ks[4], (planes,), jnp.float32)),
            'w2': jax.random.normal(ks[5], (planes, planes, 3, 3), jnp.float32) * 0.1,
            'bn2_g': 1.0 + 0.1 * jax.random.normal(ks[6], (planes,), jnp.float32),
            'bn2_b': 0.1 * jax.random.normal(ks[7], (planes,), jnp.float32),
            'bn2_m': 0.05 * jax.random.normal(ks[8], (planes,), jnp.float32),
            'bn2_v': 1.0 + 0.1 * jax.nn.softplus(jax.random.normal(ks[9], (planes,), jnp.float32)),
        }
        if with_projection:
            p.update({
                'wsc': jax.random.normal(ks[10], (planes, cin, 1, 1), jnp.float32) * 0.1,
                'bnsc_g': 1.0 + 0.1 * jax.random.normal(ks[11], (planes,), jnp.float32),
                'bnsc_b': 0.1 * jax.random.normal(ks[12], (planes,), jnp.float32),
                'bnsc_m': 0.05 * jax.random.normal(ks[13], (planes,), jnp.float32),
                'bnsc_v': 1.0 + 0.1 * jax.nn.softplus(jax.random.normal(ks[14], (planes,), jnp.float32)),
            })
        return p

    k1, k2, k3, k4 = jax.random.split(key, 4)

    # bf16 matmul operands (f32 accumulation) -> relaxed tolerance vs f32 ref.
    ATOL = RTOL = 5e-2

    # Case 1: identity shortcut (in_planes == planes, stride == 1).
    N, Cin, H, W, planes = 2, 8, 16, 16, 8
    x = jax.random.normal(k1, (N, Cin, H, W), jnp.float32)
    params = make_params(k2, Cin, planes, with_projection=False)
    prep = prepare_basic_block(params, W)          # hoisted, once per param set
    out = jax.block_until_ready(basic_block_pallas(x, prep))
    ref = jax.block_until_ready(basic_block_ref(x, params))
    assert out.shape == (N, planes, H, W), out.shape
    assert jnp.allclose(out, ref, atol=ATOL, rtol=RTOL), \
        f"identity path max abs err {float(jnp.max(jnp.abs(out - ref)))}"

    # Case 2: projection shortcut (in_planes != planes, stride == 1).
    Cin2, planes2 = 4, 8
    x2 = jax.random.normal(k3, (N, Cin2, H, W), jnp.float32)
    params2 = make_params(k4, Cin2, planes2, with_projection=True)
    prep2 = prepare_basic_block(params2, W)
    out2 = jax.block_until_ready(basic_block_pallas(x2, prep2))
    ref2 = jax.block_until_ready(basic_block_ref(x2, params2))
    assert out2.shape == (N, planes2, H, W), out2.shape
    assert jnp.allclose(out2, ref2, atol=ATOL, rtol=RTOL), \
        f"projection path max abs err {float(jnp.max(jnp.abs(out2 - ref2)))}"

    print("KERNEL_OK")
</pallas_src>

<mosaic_0001>
module attributes {stable_mosaic.version = 11 : i64} {
  func.func @kernel(%arg0: i32, %arg1: memref<32x128xf32, #tpu.memory_space<vmem>>, %arg2: memref<384x128xbf16, #tpu.memory_space<vmem>>, %arg3: memref<384x128xbf16, #tpu.memory_space<vmem>>, %arg4: memref<8x128xf32, #tpu.memory_space<vmem>>, %arg5: memref<32x128xf32, #tpu.memory_space<vmem>>) attributes {dimension_semantics = [#tpu.dimension_semantics<parallel>], iteration_bounds = array<i64: 1>, scalar_prefetch = 0 : i64, scratch_operands = 0 : i64, tpu.core_type = #tpu.core_type<tc>, window_params = [{transform_indices = @transform_0, window_bounds = array<i64: 32, 128>}, {pipeline_mode = #tpu.pipeline_mode<synchronous>, transform_indices = @transform_1, window_bounds = array<i64: 384, 128>}, {pipeline_mode = #tpu.pipeline_mode<synchronous>, transform_indices = @transform_2, window_bounds = array<i64: 384, 128>}, {pipeline_mode = #tpu.pipeline_mode<synchronous>, transform_indices = @transform_3, window_bounds = array<i64: 8, 128>}, {transform_indices = @transform_4, window_bounds = array<i64: 32, 128>}]} {
    %c0 = arith.constant 0 : index
    %c0_0 = arith.constant 0 : index
    %0 = vector.load %arg1[%c0, %c0_0] : memref<32x128xf32, #tpu.memory_space<vmem>>, vector<32x128xf32>
    %1 = tpu.iota {dimensions = array<i32: 0>} : vector<32x1xi32>
    %c16_i32 = arith.constant 16 : i32
    %c0_i32 = arith.constant 0 : i32
    %2 = arith.cmpi eq, %c16_i32, %c0_i32 : i32
    %c1_i32 = arith.constant 1 : i32
    %3 = arith.select %2, %c1_i32, %c16_i32 : i32
    %4 = vector.broadcast %3 : i32 to vector<32x1xi32>
    %5 = arith.remsi %1, %4 : vector<32x1xi32>
    %c0_i32_1 = arith.constant 0 : i32
    %6 = vector.broadcast %c0_i32_1 : i32 to vector<32x1xi32>
    %7 = arith.cmpi ne, %5, %6 : vector<32x1xi32>
    %c0_i32_2 = arith.constant 0 : i32
    %8 = vector.broadcast %c0_i32_2 : i32 to vector<32x1xi32>
    %9 = arith.cmpi slt, %5, %8 : vector<32x1xi32>
    %c0_i32_3 = arith.constant 0 : i32
    %10 = arith.cmpi slt, %3, %c0_i32_3 : i32
    %11 = vector.broadcast %10 : i1 to vector<32x1xi1>
    %12 = vector.broadcast %11 : vector<32x1xi1> to vector<32x1xi1>
    %13 = arith.xori %9, %12 : vector<32x1xi1>
    %14 = arith.andi %13, %7 : vector<32x1xi1>
    %15 = vector.broadcast %3 : i32 to vector<32x1xi32>
    %16 = arith.addi %5, %15 : vector<32x1xi32>
    %17 = arith.select %14, %16, %5 : vector<32x1xi1>, vector<32x1xi32>
    %c0_i32_4 = arith.constant 0 : i32
    %18 = vector.broadcast %c0_i32_4 : i32 to vector<32x1xi32>
    %19 = arith.cmpi eq, %17, %18 : vector<32x1xi32>
    %c15_i32 = arith.constant 15 : i32
    %20 = vector.broadcast %c15_i32 : i32 to vector<32x1xi32>
    %21 = arith.cmpi eq, %17, %20 : vector<32x1xi32>
    %c1_i32_5 = arith.constant 1 : i32
    %22 = tpu.dynamic_rotate %0 by %c1_i32_5 dim 0 : vector<32x128xf32>, i32 -> vector<32x128xf32>
    %cst = arith.constant 0.000000e+00 : f32
    %23 = vector.shape_cast %19 : vector<32x1xi1> to vector<32x1xi1>
    %24 = vector.broadcast %23 : vector<32x1xi1> to vector<32x128xi1>
    %25 = vector.broadcast %cst : f32 to vector<32x128xf32>
    %26 = arith.select %24, %25, %22 : vector<32x128xi1>, vector<32x128xf32>
    %c31_i32 = arith.constant 31 : i32
    %27 = tpu.dynamic_rotate %0 by %c31_i32 dim 0 : vector<32x128xf32>, i32 -> vector<32x128xf32>
    %cst_6 = arith.constant 0.000000e+00 : f32
    %28 = vector.shape_cast %21 : vector<32x1xi1> to vector<32x1xi1>
    %29 = vector.broadcast %28 : vector<32x1xi1> to vector<32x128xi1>
    %30 = vector.broadcast %cst_6 : f32 to vector<32x128xf32>
    %31 = arith.select %29, %30, %27 : vector<32x128xi1>, vector<32x128xf32>
    %32 = tpu.concatenate %26, %0, %31 in 1 : vector<32x128xf32>, vector<32x128xf32>, vector<32x128xf32> -> vector<32x384xf32>
    %33 = arith.truncf %32 : vector<32x384xf32> to vector<32x384xbf16>
    %c0_7 = arith.constant 0 : index
    %c0_8 = arith.constant 0 : index
    %34 = vector.load %arg2[%c0_7, %c0_8] : memref<384x128xbf16, #tpu.memory_space<vmem>>, vector<384x128xbf16>
    %cst_9 = arith.constant dense<0.000000e+00> : vector<32x128xf32>
    %35 = tpu.matmul %33, %34, %cst_9 {dimension_numbers = #tpu.dot_dimension_numbers<[1], [0], [0], [1], [0, 0, 1, 1], [], []>} : vector<32x384xbf16>, vector<384x128xbf16>, vector<32x128xf32> -> vector<32x128xf32>
    %c0_10 = arith.constant 0 : index
    %c0_11 = arith.constant 0 : index
    %36 = vector.load %arg4[%c0_10, %c0_11] : memref<8x128xf32, #tpu.memory_space<vmem>>, vector<1x128xf32>
    %37 = vector.broadcast %36 : vector<1x128xf32> to vector<32x128xf32>
    %38 = arith.mulf %35, %37 : vector<32x128xf32>
    %c1 = arith.constant 1 : index
    %c0_12 = arith.constant 0 : index
    %39 = vector.load %arg4[%c1, %c0_12] : memref<8x128xf32, #tpu.memory_space<vmem>>, vector<1x128xf32>
    %40 = vector.broadcast %39 : vector<1x128xf32> to vector<32x128xf32>
    %41 = arith.addf %38, %40 : vector<32x128xf32>
    %cst_13 = arith.constant 0.000000e+00 : f32
    %42 = vector.broadcast %cst_13 : f32 to vector<32x128xf32>
    %43 = arith.maximumf %41, %42 : vector<32x128xf32>
    %c1_i32_14 = arith.constant 1 : i32
    %44 = tpu.dynamic_rotate %43 by %c1_i32_14 dim 0 : vector<32x128xf32>, i32 -> vector<32x128xf32>
    %cst_15 = arith.constant 0.000000e+00 : f32
    %45 = vector.shape_cast %19 : vector<32x1xi1> to vector<32x1xi1>
    %46 = vector.broadcast %45 : vector<32x1xi1> to vector<32x128xi1>
    %47 = vector.broadcast %cst_15 : f32 to vector<32x128xf32>
    %48 = arith.select %46, %47, %44 : vector<32x128xi1>, vector<32x128xf32>
    %c31_i32_16 = arith.constant 31 : i32
    %49 = tpu.dynamic_rotate %43 by %c31_i32_16 dim 0 : vector<32x128xf32>, i32 -> vector<32x128xf32>
    %cst_17 = arith.constant 0.000000e+00 : f32
    %50 = vector.shape_cast %21 : vector<32x1xi1> to vector<32x1xi1>
    %51 = vector.broadcast %50 : vector<32x1xi1> to vector<32x128xi1>
    %52 = vector.broadcast %cst_17 : f32 to vector<32x128xf32>
    %53 = arith.select %51, %52, %49 : vector<32x128xi1>, vector<32x128xf32>
    %54 = tpu.concatenate %48, %43, %53 in 1 : vector<32x128xf32>, vector<32x128xf32>, vector<32x128xf32> -> vector<32x384xf32>
    %55 = arith.truncf %54 : vector<32x384xf32> to vector<32x384xbf16>
    %c0_18 = arith.constant 0 : index
    %c0_19 = arith.constant 0 : index
    %56 = vector.load %arg3[%c0_18, %c0_19] : memref<384x128xbf16, #tpu.memory_space<vmem>>, vector<384x128xbf16>
    %cst_20 = arith.constant dense<0.000000e+00> : vector<32x128xf32>
    %57 = tpu.matmul %55, %56, %cst_20 {dimension_numbers = #tpu.dot_dimension_numbers<[1], [0], [0], [1], [0, 0, 1, 1], [], []>} : vector<32x384xbf16>, vector<384x128xbf16>, vector<32x128xf32> -> vector<32x128xf32>
    %c2 = arith.constant 2 : index
    %c0_21 = arith.constant 0 : index
    %58 = vector.load %arg4[%c2, %c0_21] : memref<8x128xf32, #tpu.memory_space<vmem>>, vector<1x128xf32>
    %59 = vector.broadcast %58 : vector<1x128xf32> to vector<32x128xf32>
    %60 = arith.mulf %57, %59 : vector<32x128xf32>
    %c3 = arith.constant 3 : index
    %c0_22 = arith.constant 0 : index
    %61 = vector.load %arg4[%c3, %c0_22] : memref<8x128xf32, #tpu.memory_space<vmem>>, vector<1x128xf32>
    %62 = vector.broadcast %61 : vector<1x128xf32> to vector<32x128xf32>
    %63 = arith.addf %60, %62 : vector<32x128xf32>
    %64 = arith.addf %63, %0 : vector<32x128xf32>
    %cst_23 = arith.constant 0.000000e+00 : f32
    %65 = vector.broadcast %cst_23 : f32 to vector<32x128xf32>
    %66 = arith.maximumf %64, %65 : vector<32x128xf32>
    %c0_24 = arith.constant 0 : index
    %c0_25 = arith.constant 0 : index
    %67 = vector.load %arg5[%c0_24, %c0_25] : memref<32x128xf32, #tpu.memory_space<vmem>>, vector<32x128xf32>
    tpu.vector_store %arg5[%c0_24, %c0_25], %66 {strides = array<i32>} : memref<32x128xf32, #tpu.memory_space<vmem>>, vector<32x128xf32>,
    return
  }
  func.func @transform_0(%arg0: i32) -> (i32, i32) {
    %c0_i32 = arith.constant 0 : i32
    %c0_i32_0 = arith.constant 0 : i32
    return %arg0, %c0_i32 : i32, i32
  }
  func.func @transform_1(%arg0: i32) -> (i32, i32) {
    %c0_i32 = arith.constant 0 : i32
    %c0_i32_0 = arith.constant 0 : i32
    %c0_i32_1 = arith.constant 0 : i32
    return %c0_i32, %c0_i32_0 : i32, i32
  }
  func.func @transform_2(%arg0: i32) -> (i32, i32) {
    %c0_i32 = arith.constant 0 : i32
    %c0_i32_0 = arith.constant 0 : i32
    %c0_i32_1 = arith.constant 0 : i32
    return %c0_i32, %c0_i32_0 : i32, i32
  }
  func.func @transform_3(%arg0: i32) -> (i32, i32) {
    %c0_i32 = arith.constant 0 : i32
    %c0_i32_0 = arith.constant 0 : i32
    %c0_i32_1 = arith.constant 0 : i32
    return %c0_i32, %c0_i32_0 : i32, i32
  }
  func.func @transform_4(%arg0: i32) -> (i32, i32) {
    %c0_i32 = arith.constant 0 : i32
    %c0_i32_0 = arith.constant 0 : i32
    return %arg0, %c0_i32 : i32, i32
  }
}

</mosaic_0001>

<bundles_post_ra>
// kernel: tpu_custom_call.1
= control target key start
LH: loop header
LB: loop body
LE: loop exit
PB: predicated region body
PF: predicated region fallthrough
CT: control target
= control target key end

     0   :  { %9 = vsyncpa [#allocation3], 0  ;;  %s1416_s0 = inlined_call_operand.hbm [shape: f32[32,128], index: 0, kind: input, shape index: {}]   ;;  %s1417_s1 = inlined_call_operand.hbm [shape: bf16[384,128], index: 1, kind: input, shape index: {}]   ;;  %s1418_s2 = inlined_call_operand.hbm [shape: bf16[384,128], index: 2, kind: input, shape index: {}]   ;;  %s1419_s3 = inlined_call_operand.hbm [shape: f32[8,128], index: 3, kind: input, shape index: {}]   ;;  %s1420_s4 = inlined_call_operand.hbm [shape: f32[32,128], index: 4, kind: output, shape index: {}]  }
   0x1   :  { %10 = vsyncpa [#allocation6], 0 }
   0x2   :  { %11 = vsyncpa [#allocation9], 0 }
   0x3   :  { %12 = vsyncpa [#allocation4], 0  ;;  %s1236_s15 = smov [#allocation5]  }
   0x4   :  { %s30_s16 = sshll.u32 %s1236_s15, 4  ;;  %s31_s16 = int_to_ptr.vmem [resolvable:$true] %s30_s16 }
   0x5   :  { %s1136_s17 = scalar_lea.vmem %s31_s16, 3072  ;;  %p1141_p1 = scmp.lt.s32.totalorder %s31_s16, %s31_s16 }
   0x6   :  { %p1137_p0 = scmp.ne.s32.totalorder %s31_s16, %s1136_s17  ;;  %p1142_p2 = scmp.lt.s32.totalorder %s1136_s17, %s1136_s17 }
   0x8   :  { %p1143_p3 = por %p1142_p2, %p1141_p1 }
   0xa   :  { %p1144_p4 = pnand %p1143_p3, %p1137_p0 }
   0xc   :  { %1147 = shalt.err (!%p1144_p4)
}
   0xd   :  { %s1237_s18 = smov 64   ;;  %s1238_s19 = smov 4  }
   0xe   :  { %36 = dma.hbm_to_vmem [thread:$0]  %s1417_s1, 3072, %s31_s16, [#allocation6], %s1237_s18, %s1237_s18, %s1238_s19  }
   0xf   :  { %s1239_s22 = smov [#allocation2]  }
  0x10   :  { %s18_s23 = sshll.u32 %s1239_s22, 4  ;;  %s19_s23 = int_to_ptr.vmem [resolvable:$true] %s18_s23 }
  0x11   :  { %s1156_s24 = scalar_lea.vmem %s19_s23, 512  ;;  %p1161_p6 = scmp.lt.s32.totalorder %s19_s23, %s19_s23 }
  0x12   :  { %p1157_p5 = scmp.ne.s32.totalorder %s19_s23, %s1156_s24  ;;  %p1162_p7 = scmp.lt.s32.totalorder %s1156_s24, %s1156_s24 }
  0x14   :  { %p1163_p8 = por %p1162_p7, %p1161_p6 }
  0x16   :  { %p1164_p9 = pnand %p1163_p8, %p1157_p5 }
  0x18   :  { %1167 = shalt.err (!%p1164_p9)
}
  0x19   :  { %s1240_s25 = smov 128   ;;  %s1241_s26 = smov 8  }
  0x1a   :  { %24 = dma.hbm_to_vmem [thread:$0]  %s1416_s0, 512, %s19_s23, [#allocation3], %s1240_s25, %s1240_s25, %s1241_s26  }
  0x1b   :  { %s1242_s1 = smov [#allocation7]   ;;  %s1243_s30 = smov [#allocation8]  }
  0x1c   :  { %s42_s29 = sshll.u32 %s1242_s1, 4  ;;  %s55_s5 = sshll.u32 %s1243_s30, 4  ;;  %s43_s29 = int_to_ptr.vmem [resolvable:$true] %s42_s29  ;;  %s56_s5 = int_to_ptr.vmem [resolvable:$true] %s55_s5 }
  0x1d   :  { %s1176_s6 = scalar_lea.vmem %s43_s29, 3072  ;;  %p1181_p11 = scmp.lt.s32.totalorder %s43_s29, %s43_s29 }
  0x1e   :  { %p1177_p10 = scmp.ne.s32.totalorder %s43_s29, %s1176_s6  ;;  %p1182_p12 = scmp.lt.s32.totalorder %s1176_s6, %s1176_s6 }
  0x20   :  { %p1183_p13 = por %p1182_p12, %p1181_p11 }
  0x22   :  { %p1184_p0 = pnand %p1183_p13, %p1177_p10 }
  0x24   :  { %1187 = shalt.err (!%p1184_p0)
}
  0x25   :  { %48 = dma.hbm_to_vmem [thread:$0]  %s1418_s2, 3072, %s43_s29, [#allocation6], %s1237_s18, %s1237_s18, %s1238_s19  }
  0x26   :  { %s1196_s0 = scalar_lea.vmem %s56_s5, 128  ;;  %p1201_p2 = scmp.lt.s32.totalorder %s56_s5, %s56_s5 }
  0x27   :  { %p1197_p1 = scmp.ne.s32.totalorder %s56_s5, %s1196_s0  ;;  %p1202_p3 = scmp.lt.s32.totalorder %s1196_s0, %s1196_s0 }
  0x29   :  { %p1203_p4 = por %p1202_p3, %p1201_p2 }
  0x2b   :  { %p1204_p5 = pnand %p1203_p4, %p1197_p1 }
  0x2d   :  { %1207 = shalt.err (!%p1204_p5)
}
  0x2e   :  { %58 = dma.hbm_to_vmem [thread:$0]  %s1419_s3, 128, %s56_s5, [#allocation9]  }
  0x2f   :  { %1228 = dma.done.wait [#allocation3], 512  }
  0x30   :  { %1229 = vsyncadd [#allocation3], 4294966784 }
  0x31   :  { %1230 = dma.done.wait [#allocation6], 6144  }
  0x32   :  { %1231 = vsyncadd [#allocation6], 4294961152 }
  0x33   :  { %1232 = dma.done.wait [#allocation9], 128  }
  0x34   :  { %1233 = vsyncadd [#allocation9], 4294967168  ;;  %v1080_v0 = vld [vmem:[#allocation5 + $0x78] sm:$0xff]   ;;  %v1083_v3 = vld [vmem:[#allocation5 + $0x70] sm:$0xff]   ;;  %v76_v8 = vlaneseq  ;;  %vm1244_vm5 = vmmov 1   ;;  %s1245_s2 = smov [#allocation10]  }
  0x35   :  { %v1081_v1 = vld [vmem:[#allocation5 + $0x38] sm:$0xff]   ;;  %954 = vmatprep.subr.bf16.mxu0 %v1080_v0  ;;  %v1084_v4 = vld [vmem:[#allocation5 + $0x30] sm:$0xff]   ;;  %v1086_v6 = vld [vmem:[#allocation5 + $0x68] sm:$0xff]   ;;  %s852_s3 = sshll.u32 %s1245_s2, 4  ;;  %s853_s3 = int_to_ptr.vmem [resolvable:$true] %s852_s3 }
  0x36   :  { %v1082_v2 = vld [vmem:[#allocation5 + $0xb8] sm:$0xff]   ;;  %955 = vmatpush3.bf16.msra.mxu0 %v1081_v1  ;;  %v1085_v5 = vld [vmem:[#allocation5 + $0xb0] sm:$0xff]   ;;  %v1087_v7 = vld [vmem:[#allocation5 + $0x28] sm:$0xff]   ;;  %v1292_v13 = vshrl.u32 %v76_v8, 7  ;;  %s1208_s11 = scalar_lea.vmem %s853_s3, 512  ;;  %p1213_p7 = scmp.lt.s32.totalorder %s853_s3, %s853_s3 }
  0x37   :  { %1030 = vmatprep.subr.bf16.mxu1 %v1082_v2  ;;  %956 = vmatprep.subr.bf16.mxu0 %v1083_v3  ;;  %v1088_v9 = vld [vmem:[#allocation5 + $0xa8] sm:$0xff]   ;;  %v1089_v10 = vld [vmem:[#allocation5 + $0x60] sm:$0xff]   ;;  %v1092_v14 = vld [vmem:[#allocation5 + $0x58] sm:$0xff]   ;;  %p1209_p6 = scmp.ne.s32.totalorder %s853_s3, %s1208_s11  ;;  %p1214_p8 = scmp.lt.s32.totalorder %s1208_s11, %s1208_s11 }
  0x38   :  { %1031 = vmatpush3.bf16.msra.mxu1 %v1082_v2  ;;  %v1090_v11 = vld [vmem:[#allocation5 + $0x20] sm:$0xff]   ;;  %v1094_v15 = vld [vmem:[#allocation5 + $0x98] sm:$0xff]   ;;  %v78_v17 = vadd.s32 8, %v1292_v13  ;;  %v1095_v18 = vld [vmem:[#allocation5 + $0x50] sm:$0xff]   ;;  %v80_v19 = vadd.s32 24, %v1292_v13  ;;  %v85_v20 = vand.u32 15, %v1292_v13 }
  0x39   :  { %1032 = vmatprep.subr.bf16.mxu1 %v1085_v5  ;;  %v1091_v12 = vld [vmem:[#allocation5 + $0xa0] sm:$0xff]   ;;  %v1093_v16 = vld [vmem:[#allocation5 + $0x18] sm:$0xff]   ;;  %v1097_v21 = vld [vmem:[#allocation5 + $0x90] sm:$0xff]   ;;  %v79_v22 = vadd.s32 16, %v1292_v13  ;;  %vm141_vm0 = vcmp.lt.s32.totalorder %v1292_v13, 1  ;;  %vm162_vm3 = vcmp.lt.s32.totalorder %v1292_v13, 7  ;;  %p1215_p9 = por %p1214_p8, %p1213_p7 }
  0x3a   :  { %957 = vmatpush3.bf16.msra.mxu0 %v1084_v4  ;;  %v1096_v23 = vld [vmem:[#allocation5 + $0x10] sm:$0xff]   ;;  %v92_v24 = vand.u32 15, %v78_v17  ;;  %v1098_v25 = vld [vmem:[#allocation5 + $0x48] sm:$0xff]   ;;  %v106_v26 = vand.u32 15, %v80_v19  ;;  %vm1299_vm1 = vcmp.ne.s32.totalorder %v85_v20, 0  ;;  %v1101_v30 = vld [vmem:[#allocation5 + $0x40] sm:$0xff]  }
  0x3b   :  { %958 = vmatprep.subr.bf16.mxu0 %v1086_v6  ;;  %v1099_v27 = vld [vmem:[#allocation5 + $0x8] sm:$0xff]   ;;  %v1103_v32 = vld [vmem:[#allocation5 + $0x80] sm:$0xff]   ;;  %v1311_v35 = vld [vmem:[#allocation2 + $0x18] sm:$0xff]  ;;  %v99_v37 = vand.u32 15, %v79_v22  ;;  %p1216_p10 = pnand %p1215_p9, %p1209_p6 }
  0x3c   :  { %1033 = vmatpush3.bf16.msra.mxu1 %v1085_v5  ;;  %v1100_v28 = vld [vmem:[#allocation5 + $0x88] sm:$0xff]   ;;  %vm1303_vm2 = vcmp.ne.s32.totalorder %v92_v24, 15  ;;  %v1307_v33 = vld [vmem:[#allocation2] sm:$0xff]  ;;  %vm1314_vm4 = vcmp.ne.s32.totalorder %v106_v26, 15  ;;  %v140_v41 = vrot.slane %v1311_v35, 7  ;;  %vm1326_vm6 = vmpackc.low %vm1244_vm5, %vm1299_vm1  ;;  %v161_v48 = vrot.slane %v1311_v35, 1 }
  0x3d   :  { %1034 = vmatprep.subr.bf16.mxu1 %v1088_v9  ;;  %v1309_v34 = vld [vmem:[#allocation2 + $0x8] sm:$0xff]  ;;  %v137_v38 = vrot.slane %v1307_v33, 7  ;;  %v1330_v43 = vld [vmem:[#allocation2 + $0x10] sm:$0xff]  ;;  %v158_v44 = vrot.slane %v1307_v33, 1  ;;  %vm1338_vm7 = vmpackc.low %vm1303_vm2, %vm1244_vm5  ;;  %vm951_vm9 = vcmp.ne.s32.totalorder %v99_v37, 0 }
  0x3e   :  { %959 = vmatpush3.bf16.msra.mxu0 %v1087_v7  ;;  %v138_v39 = vrot.slane %v1309_v34, 7  ;;  %v180_v40 = vpack.c.bf16 %v1309_v34, %v1307_v33  ;;  %v159_v45 = vrot.slane %v1309_v34, 1  ;;  %v160_v46 = vrot.slane %v1330_v43, 1  ;;  %v1102_v49 = vld [vmem:[#allocation5] sm:$0xff]   ;;  %vm1350_vm8 = vmpackc.low %vm1314_vm4, %vm1244_vm5  ;;  %v1104_v55 = vld [vmem:[#allocation7 + $0x78] sm:$0xff]  }
  0x3f   :  { %960 = vmatprep.subr.bf16.mxu0 %v1089_v10  ;;  %v145_v51 = vsel %vm141_vm0, %v140_v41, %v137_v38  ;;  %v1105_v56 = vld [vmem:[#allocation7 + $0xb8] sm:$0xff]   ;;  %v166_v59 = vsel %vm162_vm3, %v161_v48, %v158_v44  ;;  %v139_v60 = vrot.slane %v1330_v43, 7  ;;  %v183_v63 = vpack.c.bf16 %v1311_v35, %v1330_v43  ;;  %vm1368_vm10 = vmpackc.low %vm1244_vm5, %vm951_vm9  ;;  %v1107_v5 = vld [vmem:[#allocation7 + $0x70] sm:$0xff]  }
  0x40   :  { %1035 = vmatpush3.bf16.msra.mxu1 %v1088_v9  ;;  %409 = vmatprep.mubr.bf16.mxu0 %v180_v40  ;;  %v144_v50 = vsel %vm141_vm0, %v137_v38, %v138_v39  ;;  %v164_v53 = vsel %vm162_vm3, %v159_v45, %v160_v46  ;;  %v165_v54 = vsel %vm162_vm3, %v158_v44, %v159_v45  ;;  %v1106_v61 = vld [vmem:[#allocation7 + $0x38] sm:$0xff]   ;;  %v1108_v6 = vld [vmem:[#allocation7 + $0xb0] sm:$0xff]   ;;  %v1110_v8 = vld [vmem:[#allocation7 + $0x68] sm:$0xff]  }
  0x41   :  { %1036 = vmatprep.subr.bf16.mxu1 %v1091_v12  ;;  %v900_v57 = vpack.c.bf16 %v164_v53, %v165_v54  ;;  %v163_v58 = vsel %vm162_vm3, %v160_v46, %v161_v48  ;;  %v892_v62 = vpack.c.bf16 %v144_v50, %v145_v51  ;;  %v142_v2 = vsel %vm141_vm0, %v139_v60, %v140_v41  ;;  %v1109_v7 = vld [vmem:[#allocation7 + $0x30] sm:$0xff]   ;;  %v1111_v9 = vld [vmem:[#allocation7 + $0xa8] sm:$0xff]   ;;  %v1118_v17 = vld [vmem:[#allocation7 + $0x18] sm:$0xff]  }
  0x42   :  { %961 = vmatpush3.bf16.msra.mxu0 %v1090_v11  ;;  %v904_v1 = vpack.c.bf16 %v166_v59, %v163_v58  ;;  %v143_v3 = vsel %vm141_vm0, %v138_v39, %v139_v60  ;;  %v1112_v10 = vld [vmem:[#allocation7 + $0x28] sm:$0xff]   ;;  %v1113_v11 = vld [vmem:[#allocation7 + $0x60] sm:$0xff]   ;;  %v1120_v19 = vld [vmem:[#allocation7 + $0x90] sm:$0xff]  }
  0x43   :  { %962 = vmatprep.subr.bf16.mxu0 %v1092_v14  ;;  %1046 = vmatprep.mubr.msk.bf16.mxu1 %vm1338_vm7, %v900_v57  ;;  %v896_v4 = vpack.c.bf16 %v142_v2, %v143_v3  ;;  %v1115_v14 = vld [vmem:[#allocation7 + $0x20] sm:$0xff]   ;;  %v1121_v20 = vld [vmem:[#allocation7 + $0x10] sm:$0xff]   ;;  %v1123_v22 = vld [vmem:[#allocation7 + $0x88] sm:$0xff]  }
  0x44   :  { %1037 = vmatpush3.bf16.msra.mxu1 %v1091_v12  ;;  %v1114_v12 = vld [vmem:[#allocation7 + $0xa0] sm:$0xff]  }
  0x45   :  { %1038 = vmatprep.subr.bf16.mxu1 %v1094_v15  ;;  %v1125_v24 = vld [vmem:[#allocation7 + $0x40] sm:$0xff]  }
  0x46   :  { %963 = vmatpush3.bf16.msra.mxu0 %v1093_v16  ;;  %v1117_v16 = vld [vmem:[#allocation7 + $0x98] sm:$0xff]   ;;  %v1127_v26 = vld [vmem:[#allocation7] sm:$0xff]  }
  0x47   :  { %964 = vmatprep.subr.bf16.mxu0 %v1095_v18  ;;  %v1119_v18 = vld [vmem:[#allocation7 + $0x50] sm:$0xff]   ;;  %v906_v37 = vld [vmem:[#allocation8] ss:$0 sm:$0xff]  ;;  %v907_v46 = vld [vmem:[#allocation8 + $0x1] ss:$0 sm:$0xff] }
  0x48   :  { %1039 = vmatpush3.bf16.msra.mxu1 %v1094_v15  ;;  %v1116_v15 = vld [vmem:[#allocation7 + $0x58] sm:$0xff]  }
  0x49   :  { %1040 = vmatprep.subr.bf16.mxu1 %v1097_v21 }
  0x4a   :  { %965 = vmatpush3.bf16.msra.mxu0 %v1096_v23  ;;  %v1124_v23 = vld [vmem:[#allocation7 + $0x8] sm:$0xff]  }
  0x4b   :  { %966 = vmatprep.subr.bf16.mxu0 %v1098_v25  ;;  %v1126_v25 = vld [vmem:[#allocation7 + $0x80] sm:$0xff]  }
  0x4c   :  { %1041 = vmatpush3.bf16.msra.mxu1 %v1097_v21  ;;  %v1122_v21 = vld [vmem:[#allocation7 + $0x48] sm:$0xff]  }
  0x4d   :  { %1042 = vmatprep.subr.bf16.mxu1 %v1100_v28 }
  0x4e   :  { %967 = vmatpush3.bf16.msra.mxu0 %v1099_v27 }
  0x4f   :  { %968 = vmatprep.subr.bf16.mxu0 %v1101_v30 }
  0x50   :  { %1043 = vmatpush3.bf16.msra.mxu1 %v1100_v28 }
  0x51   :  { %1044 = vmatprep.subr.bf16.mxu1 %v1103_v32 }
  0x52   :  { %969 = vmatpush3.bf16.msra.mxu0 %v1102_v49 }
  0x53   :  { %992 = vmatprep.subr.bf16.mxu0 %v1104_v55 }
  0x54   :  { %1045 = vmatpush3.bf16.msra.mxu1 %v1103_v32 }
  0x55   :  { %893 = vmatmul.mubr.msk.bf16.vlgmr.msra.gmra.mxu0 %vm1326_vm6, %v892_v62  ;;  %1050 = vmatprep.subr.bf16.mxu1 %v1105_v56 }
  0x56   :  { %417 = vmatprep.mubr.bf16.mxu0 %v183_v63  ;;  %993 = vmatpush3.bf16.msra.mxu0 %v1106_v61 }
  0x57   :  { %1047 = vmatmul.mubr.msk.bf16.vlgmr.msra.gmra.mxu1 %vm1350_vm8, %v904_v1  ;;  %994 = vmatprep.subr.bf16.mxu0 %v1107_v5 }
  0x58   :  { %1051 = vmatpush3.bf16.msra.mxu1 %v1105_v56 }
  0x59   :  { %1052 = vmatprep.subr.bf16.mxu1 %v1108_v6 }
  0x5a   :  { %995 = vmatpush3.bf16.msra.mxu0 %v1109_v7 }
  0x5b   :  { %996 = vmatprep.subr.bf16.mxu0 %v1110_v8 }
  0x5c   :  { %1053 = vmatpush3.bf16.msra.mxu1 %v1108_v6 }
  0x5d   :  { %897 = vmatmul.mubr.msk.bf16.gmra.mxu0 %vm1368_vm10, %v896_v4  ;;  %1054 = vmatprep.subr.bf16.mxu1 %v1111_v9 }
  0x5e   :  { %997 = vmatpush3.bf16.msra.mxu0 %v1112_v10 }
  0x5f   :  { %998 = vmatprep.subr.bf16.mxu0 %v1113_v11 }
  0x60   :  { %1055 = vmatpush3.bf16.msra.mxu1 %v1111_v9 }
  0x61   :  { %1056 = vmatprep.subr.bf16.mxu1 %v1114_v12 }
  0x62   :  { %999 = vmatpush3.bf16.msra.mxu0 %v1115_v14 }
  0x63   :  { %1000 = vmatprep.subr.bf16.mxu0 %v1116_v15 }
  0x64   :  { %1057 = vmatpush3.bf16.msra.mxu1 %v1114_v12 }
  0x65   :  { %1058 = vmatprep.subr.bf16.mxu1 %v1117_v16 }
  0x66   :  { %1001 = vmatpush3.bf16.msra.mxu0 %v1118_v17 }
  0x67   :  { %1002 = vmatprep.subr.bf16.mxu0 %v1119_v18 }
  0x68   :  { %1059 = vmatpush3.bf16.msra.mxu1 %v1117_v16 }
  0x69   :  { %1060 = vmatprep.subr.bf16.mxu1 %v1120_v19 }
  0x6a   :  { %1003 = vmatpush3.bf16.msra.mxu0 %v1121_v20 }
  0x6b   :  { %1004 = vmatprep.subr.bf16.mxu0 %v1122_v21 }
  0x6c   :  { %1061 = vmatpush3.bf16.msra.mxu1 %v1120_v19 }
  0x6d   :  { %1062 = vmatprep.subr.bf16.mxu1 %v1123_v22 }
  0x6e   :  { %1005 = vmatpush3.bf16.msra.mxu0 %v1124_v23 }
  0x6f   :  { %1006 = vmatprep.subr.bf16.mxu0 %v1125_v24 }
  0x70   :  { %1063 = vmatpush3.bf16.msra.mxu1 %v1123_v22 }
  0x71   :  { %1064 = vmatprep.subr.bf16.mxu1 %v1126_v25 }
  0x72   :  { %1007 = vmatpush3.bf16.msra.mxu0 %v1127_v26 }
  0x74   :  { %1065 = vmatpush3.bf16.msra.mxu1 %v1126_v25 }
 0x115   :  { %v970_v27 = vpop.f32.mrf.mxu0 }
 0x117   :  { %v971_v28 = vpop.f32.mrf.mxu0  ;;  %v1048_v29 = vpop.f32.mrf.mxu1 }
 0x118   :  { %v972_v30 = vadd.f32 %v971_v28, %v970_v27 }
 0x119   :  { %v973_v31 = vpop.f32.mrf.mxu0  ;;  %v460_v32 = vpop.f32.mrf.mxu1 }
 0x11a   :  { %v461_v36 = vadd.f32 %v972_v30, %v460_v32 }
 0x11b   :  { %v974_v38 = vpop.f32.mrf.mxu0  ;;  %v1049_v39 = vpop.f32.mrf.mxu1 }
 0x11c   :  { %v975_v40 = vadd.f32 %v974_v38, %v973_v31  ;;  %v480_v41 = vmul.f32 %v906_v37, %v461_v36  ;;  %v948_v31 = vld [vmem:[#allocation8 + $0x2] ss:$0 sm:$0xff] }
 0x11d   :  { %v976_v44 = vpop.f32.mrf.mxu0  ;;  %v463_v45 = vpop.f32.mrf.mxu1 }
 0x11e   :  { %v464_v48 = vadd.f32 %v975_v40, %v463_v45  ;;  %v489_v53 = vadd.f32 %v907_v46, %v480_v41 }
 0x11f   :  { %v977_v49 = vpop.f32.mrf.mxu0 }
 0x120   :  { %v481_v50 = vmul.f32 %v906_v37, %v464_v48  ;;  %v978_v51 = vadd.f32 %v977_v49, %v976_v44  ;;  %v493_v61 = vmax.f32 %v489_v53, 0.0 }
 0x121   :  { %v979_v54 = vpop.f32.mrf.mxu0 }
 0x122   :  { %v490_v55 = vadd.f32 %v907_v46, %v481_v50  ;;  %v469_v56 = vadd.f32 %v1048_v29, %v978_v51  ;;  %v509_v5 = vrot.slane %v493_v61, 1  ;;  %v497_v14 = vrot.slane %v493_v61, 7 }
 0x123   :  { %v980_v57 = vpop.f32.mrf.mxu0 }
 0x124   :  { %v494_v58 = vmax.f32 %v490_v55, 0.0  ;;  %v482_v59 = vmul.f32 %v906_v37, %v469_v56  ;;  %v981_v60 = vadd.f32 %v980_v57, %v979_v54 }
 0x126   :  { %v491_v62 = vadd.f32 %v907_v46, %v482_v59  ;;  %v472_v63 = vadd.f32 %v1049_v39, %v981_v60  ;;  %v522_v1 = vpack.c.bf16 %v494_v58, %v493_v61  ;;  %v510_v2 = vrot.slane %v494_v58, 1 }
 0x127   :  { %v498_v8 = vrot.slane %v494_v58, 7 }
 0x128   :  { %v495_v3 = vmax.f32 %v491_v62, 0.0  ;;  %v483_v4 = vmul.f32 %v906_v37, %v472_v63  ;;  %751 = vmatprep.mubr.bf16.mxu0 %v522_v1  ;;  %v515_v11 = vsel %vm162_vm3, %v509_v5, %v510_v2  ;;  %v949_v37 = vld [vmem:[#allocation8 + $0x3] ss:$0 sm:$0xff] }
 0x129   :  { %v503_v17 = vsel %vm141_vm0, %v497_v14, %v498_v8 }
 0x12a   :  { %v511_v6 = vrot.slane %v495_v3, 1  ;;  %v492_v7 = vadd.f32 %v907_v46, %v483_v4  ;;  %v499_v47 = vrot.slane %v495_v3, 7 }
 0x12c   :  { %v496_v9 = vmax.f32 %v492_v7, 0.0  ;;  %v514_v10 = vsel %vm162_vm3, %v510_v2, %v511_v6  ;;  %v502_v25 = vsel %vm141_vm0, %v498_v8, %v499_v47 }
 0x12d   :  { %v942_v12 = vpack.c.bf16 %v514_v10, %v515_v11 }
 0x12e   :  { %v500_v15 = vrot.slane %v496_v9, 7  ;;  %v512_v16 = vrot.slane %v496_v9, 1  ;;  %v525_v23 = vpack.c.bf16 %v496_v9, %v495_v3 }
 0x12f   :  { %1066 = vmatprep.mubr.msk.bf16.mxu1 %vm1338_vm7, %v942_v12 }
 0x130   :  { %v504_v18 = vsel %vm141_vm0, %v500_v15, %v497_v14  ;;  %v513_v19 = vsel %vm162_vm3, %v511_v6, %v512_v16  ;;  %v516_v20 = vsel %vm162_vm3, %v512_v16, %v509_v5  ;;  %v501_v24 = vsel %vm141_vm0, %v499_v47, %v500_v15 }
 0x131   :  { %v934_v21 = vpack.c.bf16 %v503_v17, %v504_v18  ;;  %v946_v22 = vpack.c.bf16 %v516_v20, %v513_v19  ;;  %v938_v26 = vpack.c.bf16 %v501_v24, %v502_v25 }
 0x133   :  { %935 = vmatmul.mubr.msk.bf16.vlgmr.msra.gmra.mxu0 %vm1326_vm6, %v934_v21  ;;  %1067 = vmatmul.mubr.msk.bf16.vlgmr.msra.gmra.mxu1 %vm1350_vm8, %v946_v22 }
 0x134   :  { %759 = vmatprep.mubr.bf16.mxu0 %v525_v23 }
 0x13b   :  { %939 = vmatmul.mubr.msk.bf16.gmra.mxu0 %vm1368_vm10, %v938_v26 }
 0x1f3   :  { %v1008_v27 = vpop.f32.mrf.mxu0  ;;  %v1068_v28 = vpop.f32.mrf.mxu1 }
 0x1f5   :  { %v1009_v29 = vpop.f32.mrf.mxu0  ;;  %v802_v42 = vpop.f32.mrf.mxu1 }
 0x1f6   :  { %v1010_v30 = vadd.f32 %v1009_v29, %v1008_v27 }
 0x1f7   :  { %v1011_v52 = vpop.f32.mrf.mxu0  ;;  %v1069_v32 = vpop.f32.mrf.mxu1 }
 0x1f8   :  { %v803_v36 = vadd.f32 %v1010_v30, %v802_v42 }
 0x1f9   :  { %v1012_v38 = vpop.f32.mrf.mxu0  ;;  %v805_v41 = vpop.f32.mrf.mxu1 }
 0x1fa   :  { %v822_v39 = vmul.f32 %v948_v31, %v803_v36  ;;  %v1013_v40 = vadd.f32 %v1012_v38, %v1011_v52 }
 0x1fb   :  { %v1014_v13 = vpop.f32.mrf.mxu0 }
 0x1fc   :  { %v831_v44 = vadd.f32 %v949_v37, %v822_v39  ;;  %v806_v45 = vadd.f32 %v1013_v40, %v805_v41 }
 0x1fd   :  { %v1015_v46 = vpop.f32.mrf.mxu0 }
 0x1fe   :  { %v835_v0 = vadd.f32 %v831_v44, %v1307_v33  ;;  %v823_v48 = vmul.f32 %v948_v31, %v806_v45  ;;  %v1016_v49 = vadd.f32 %v1015_v46, %v1014_v13 }
 0x1ff   :  { %v1017_v50 = vpop.f32.mrf.mxu0 }
 0x200   :  { %v839_v51 = vmax.f32 %v835_v0, 0.0  ;;  %v832_v53 = vadd.f32 %v949_v37, %v823_v48  ;;  %v811_v54 = vadd.f32 %v1068_v28, %v1016_v49 }
 0x201   :  { %v1018_v55 = vpop.f32.mrf.mxu0 }
 0x202   :  { %843 = vst [vmem:[#allocation10] sm:$0xff] %v839_v51  ;;  %v836_v56 = vadd.f32 %v832_v53, %v1309_v34  ;;  %v824_v57 = vmul.f32 %v948_v31, %v811_v54  ;;  %v1019_v58 = vadd.f32 %v1018_v55, %v1017_v50 }
 0x204   :  { %v840_v59 = vmax.f32 %v836_v56, 0.0  ;;  %v833_v60 = vadd.f32 %v949_v37, %v824_v57  ;;  %v814_v61 = vadd.f32 %v1069_v32, %v1019_v58 }
 0x206   :  { %844 = vst [vmem:[#allocation10 + $0x8] sm:$0xff] %v840_v59  ;;  %v837_v62 = vadd.f32 %v833_v60, %v1330_v43  ;;  %v825_v63 = vmul.f32 %v948_v31, %v814_v61 }
 0x208   :  { %v841_v33 = vmax.f32 %v837_v62, 0.0  ;;  %v834_v1 = vadd.f32 %v949_v37, %v825_v63 }
 0x20a   :  { %845 = vst [vmem:[#allocation10 + $0x10] sm:$0xff] %v841_v33  ;;  %v838_v2 = vadd.f32 %v834_v1, %v1311_v35 }
 0x20c   :  { %v842_v3 = vmax.f32 %v838_v2, 0.0 }
 0x20e   :  { %846 = vst [vmem:[#allocation10 + $0x18] sm:$0xff] %v842_v3 }
 0x20f   :  { %1219 = shalt.err (!%p1216_p10)
}
 0x210   :  { %858 = dma.vmem_to_hbm [thread:$0]  %s853_s3, 512, %s1420_s4, [#allocation4], %s1240_s25, %s1240_s25, %s1241_s26  }
 0x211   :  { %1234 = dma.done.wait [#allocation4], 512  }
 0x212   :  { %1235 = vsyncadd [#allocation4], 4294966784 }
 0x213   :  { %862 = vsyncpa [#allocation3], 1 }
 0x214   :  { %863 = vsyncpa [#allocation6], 1 }
 0x215   :  { %864 = vsyncpa [#allocation9], 1 }
 0x216   :  { %865 = vsyncpa [#allocation4], 1 }

</bundles_post_ra>
